<compile_context>
chip_gen: v7x
topology: tpu7x:2x2x1
jax: 0.10.0
libtpu: 0.0.40
codegen_flags: <defaults>
</compile_context>

<pallas_src>
import numpy as np
import jax
import jax.numpy as jnp
from jax.experimental import pallas as pl
from jax.experimental.pallas import tpu as pltpu


# --------------------------------------------------------------------------- #
# Kernel bodies
# --------------------------------------------------------------------------- #
def _pool_epilogue(logits2d, emb2d, expand_ref, bc, s, e, compute_dtype, out_ref):
    """Shared epilogue: lane-dense softmax over S + pooled contraction."""
    n_heads = expand_ref.shape[0]

    # Transpose BEFORE the softmax -> max/sub/exp/sum are lane-dense over S.
    logits_t = jnp.swapaxes(logits2d.reshape(bc, s, n_heads), 1, 2)      # (bc,H,S)
    m = jnp.max(logits_t, axis=-1, keepdims=True)                        # (bc,H,1)
    p = jnp.exp(logits_t - m)                                            # (bc,H,S)
    l = jnp.sum(p, axis=-1, keepdims=True)                               # (bc,H,1)

    emb3 = emb2d.reshape(bc, s, e)                                       # (bc,S,E)

    # Pooled contraction over S on the MXU; bf16 operands when requested,
    # f32 accumulation always.  (astype is a no-op on the f32 path.)
    heads = jnp.einsum('bhs,bse->bhe',
                       p.astype(compute_dtype), emb3.astype(compute_dtype),
                       preferred_element_type=jnp.float32)               # (bc,H,E)

    # Fold the softmax denominator once per (slab, head) after the contraction.
    if compute_dtype == jnp.float32:
        inv_l = 1.0 / l                          # exact: bit-level parity path
    else:
        inv_l = pl.reciprocal(l, approx=True)    # EUP slot, effectively free
    heads = heads * inv_l

    # Head selection: pooled[., e] = heads[., e // head_dim, e].
    pooled = jnp.sum(heads * expand_ref[...][None, :, :], axis=1)        # (bc,E)
    out_ref[...] = pooled.astype(out_ref.dtype)


def _attention_pool_kernel_fused(x_ref, w1_ref, b1_ref, w2_ref, b2_ref,
                                 expand_ref, out_ref):
    """Layer-2 fused as a block-diagonal matmul (v6e / v7x path)."""
    bc, s, e = x_ref.shape
    cdtype = w1_ref.dtype

    # (bc,S,E) -> (bc*S,E) is layout preserving (S % 8 == 0, E on lanes).
    # Cast per block in-kernel: x stays f32 in HBM (no wrapper astype pass).
    x2d = x_ref[...].reshape(bc * s, e).astype(cdtype)

    # Layer 1 of both sub-MLPs fused (shared LHS x): one MXU pass.
    h = jnp.dot(x2d, w1_ref[...], preferred_element_type=jnp.float32) + b1_ref[...]
    h = jnp.maximum(h, 0.0).astype(cdtype)

    # Layer 2 of both sub-MLPs fused as a block-diagonal matmul.  Column order
    # is [E | n_heads] so the emb slice sits on a lane-tile boundary.
    out2 = jnp.dot(h, w2_ref[...], preferred_element_type=jnp.float32) + b2_ref[...]
    emb2d = out2[:, :e]                  # (bc*S, E)        value-MLP output
    logits2d = out2[:, e:]               # (bc*S, n_heads)  attention-MLP output

    _pool_epilogue(logits2d, emb2d, expand_ref, bc, s, e, cdtype, out_ref)


def _attention_pool_kernel_split(x_ref, w1_ref, b1_ref, wa2_ref, ba2_ref,
                                 wv2_ref, bv2_ref, expand_ref, out_ref):
    """Separate layer-2 matmuls (v5e path, 128-wide MXU).  hid_a is padded to a
    multiple of 128 by the wrapper so the h split is a free lane-tile slice."""
    bc, s, e = x_ref.shape
    cdtype = w1_ref.dtype
    hid_a = wa2_ref.shape[0]

    x2d = x_ref[...].reshape(bc * s, e).astype(cdtype)
    h = jnp.dot(x2d, w1_ref[...], preferred_element_type=jnp.float32) + b1_ref[...]
    h = jnp.maximum(h, 0.0).astype(cdtype)

    h_a = h[:, :hid_a]
    h_v = h[:, hid_a:]

    logits2d = jnp.dot(h_a, wa2_ref[...],
                       preferred_element_type=jnp.float32) + ba2_ref[...]
    emb2d = jnp.dot(h_v, wv2_ref[...],
                    preferred_element_type=jnp.float32) + bv2_ref[...]

    _pool_epilogue(logits2d, emb2d, expand_ref, bc, s, e, cdtype, out_ref)


# --------------------------------------------------------------------------- #
# Wrapper helpers
# --------------------------------------------------------------------------- #
def _round_up(x, m):
    return ((x + m - 1) // m) * m


def _block_spec(shape, index_map, buffers=None):
    """BlockSpec with optional pipeline depth; falls back gracefully if this
    jax version does not support pipeline_mode / pl.Buffered."""
    if buffers is not None:
        try:
            return pl.BlockSpec(shape, index_map,
                                pipeline_mode=pl.Buffered(buffers))
        except Exception:
            pass
    return pl.BlockSpec(shape, index_map)


def _vmem_limit_bytes(headroom_bytes=8 << 20, fallback_bytes=64 << 20):
    """Scoped VMEM limit = physical capacity - headroom (raises v5e/v6e's
    16/32 MiB default, stays ~8 MiB under v7x's 64 MiB physical)."""
    try:
        cap = pltpu.get_tpu_info().vmem_capacity_bytes
    except Exception:   # interpret mode / older runtimes
        cap = fallback_bytes
    return int(max(cap - headroom_bytes, 24 << 20))


def _derive_rows_cap(E, hid_total, n_heads, *, vmem_limit, weight_bytes,
                     compute_itemsize, x_itemsize, x_buffers):
    """Max rows (= n_slabs * S) of the per-step working set that fit VMEM."""
    per_row = (x_buffers * E * x_itemsize              # pipelined x block(s)
               + hid_total * (4 + compute_itemsize)    # h (f32) + cast copy
               + (E + n_heads) * 4                     # layer-2 output (f32)
               + E * (4 + compute_itemsize)            # emb view/cast + staging
               + 4 * n_heads * 4)                      # logits_t / p / temporaries
    budget = int(0.7 * max(vmem_limit - weight_bytes, 1 << 20))
    return max(budget // per_row, 8)


def _pick_bc_tile(bc, s, rows_cap, *, min_grid=2):
    """Largest divisor of bc that (a) is a multiple of 8 or == bc (so the
    (bc_tile, E) output block obeys the (8,128) rule), (b) keeps bc_tile*S
    within rows_cap, and (c) leaves >= min_grid grid steps (2 TensorCores on
    v7x + DMA/compute overlap) whenever possible."""
    cands = [d for d in range(1, bc + 1)
             if bc % d == 0 and (d % 8 == 0 or d == bc)]
    fitting = [d for d in cands if d * s <= rows_cap]
    if fitting:
        multi = [d for d in fitting if bc // d >= min_grid]
        return max(multi) if multi else max(fitting)
    # Even one slab exceeds the budget: smallest legal tile; rely on
    # vmem_limit_bytes (TODO(synk): S-axis tiling for this regime).
    return min(cands)


# --------------------------------------------------------------------------- #
# Public entry point
# --------------------------------------------------------------------------- #
def attention_pool(x, params, n_heads, *, bc_tile=None, matmul_dtype=None,
                   fuse_layer2=True, x_buffers=2):
    """x: (B, C, H, W, E) -> (B, C, E).

    matmul_dtype : cast matmul operands only (e.g. jnp.bfloat16 — recommended
                   on v5e/v6e/v7x); softmax stats and accumulation stay f32.
    fuse_layer2  : block-diagonal layer-2 fusion (True for v6e/v7x's 256-wide
                   MXU; pass False on v5e's 128-wide MXU).
    x_buffers    : pipeline depth of the x block (3 can hide DMA on v5e/v6e's
                   128 MiB VMEM; keep 2 on v7x's 64 MiB).
    """
    B, C, Hs, Ws, E = x.shape
    S = Hs * Ws
    BC = B * C
    assert n_heads > 0 and E % n_heads == 0, (E, n_heads)
    head_dim = E // n_heads
    # S must be a sublane multiple so the (bc,S,E) <-> (bc*S,E) reshapes are
    # layout preserving (no per-step relayout copies).
    assert S % 8 == 0, f"H*W={S} must be a multiple of 8 (pad the spatial grid)"
    # NOTE: E a multiple of 128 keeps every lane slice / output store unmasked;
    # smaller E still runs correctly, just with masked lanes.

    wa1, ba1, wa2, ba2, wv1, bv1, wv2, bv2 = params
    hid_a, hid_v = wa1.shape[1], wv1.shape[1]

    cdtype = jnp.float32 if matmul_dtype is None else matmul_dtype
    c_itemsize = np.dtype(cdtype).itemsize

    if fuse_layer2:
        # Layer-1: shared LHS -> concatenate columns.  Layer-2: block-diagonal,
        # column order [E | n_heads] so the emb slice is lane-tile aligned.
        w1 = jnp.concatenate([wa1, wv1], axis=1)            # (E, hid_a+hid_v)
        b1 = jnp.concatenate([ba1, bv1], axis=1)
        w2 = jnp.zeros((hid_a + hid_v, E + n_heads), jnp.float32)
        w2 = w2.at[:hid_a, E:].set(wa2)
        w2 = w2.at[hid_a:, :E].set(wv2)
        b2 = jnp.concatenate([bv2, ba2], axis=1)
        weights = [w1.astype(cdtype), b1, w2.astype(cdtype), b2]
        kernel = _attention_pool_kernel_fused
        hid_total = hid_a + hid_v
    else:
        # v5e path: keep layer-2 split but pad hid_a to a 128-lane tile so the
        # in-kernel h split lands on a lane-tile boundary (zero-padded columns
        # of layer-1 / zero rows of wa2 contribute nothing).
        hid_a_p = _round_up(hid_a, 128)
        pad = hid_a_p - hid_a
        wa1_p = jnp.pad(wa1, ((0, 0), (0, pad)))
        ba1_p = jnp.pad(ba1, ((0, 0), (0, pad)))
        wa2_p = jnp.pad(wa2, ((0, pad), (0, 0)))
        w1 = jnp.concatenate([wa1_p, wv1], axis=1)
        b1 = jnp.concatenate([ba1_p, bv1], axis=1)
        weights = [w1.astype(cdtype), b1, wa2_p.astype(cdtype), ba2,
                   wv2.astype(cdtype), bv2]
        kernel = _attention_pool_kernel_split
        hid_total = hid_a_p + hid_v

    # 0/1 head-selection mask: expand[h, e] = 1 iff e // head_dim == h.
    expand = (jnp.arange(E)[None, :] // head_dim
              == jnp.arange(n_heads)[:, None]).astype(jnp.float32)  # (n_heads, E)

    # x stays in its original dtype in HBM; the cast to cdtype (if any) happens
    # per block INSIDE the kernel — no extra HBM round trip of x.
    x_flat = x.reshape(BC, S, E)

    vmem_limit = _vmem_limit_bytes()
    if bc_tile is None:
        weight_bytes = (sum(int(w.size) * w.dtype.itemsize for w in weights)
                        + int(expand.size) * 4)
        rows_cap = _derive_rows_cap(
            E, hid_total, n_heads, vmem_limit=vmem_limit,
            weight_bytes=weight_bytes, compute_itemsize=c_itemsize,
            x_itemsize=x.dtype.itemsize, x_buffers=x_buffers)
        bc_tile = _pick_bc_tile(BC, S, rows_cap)
    assert BC % bc_tile == 0 and (bc_tile % 8 == 0 or bc_tile == BC), (BC, bc_tile)

    # x block: default double-buffered; optionally deeper (v5e/v6e only).
    x_spec = _block_spec((bc_tile, S, E), lambda i: (i, 0, 0),
                         buffers=None if x_buffers == 2 else x_buffers)

    def const_spec(arr):
        # Whole-array block, constant index map -> single buffer (Buffered(1)):
        # double-buffering a never-changing block only wastes VMEM (v7x: 64 MiB).
        nd = arr.ndim
        return _block_spec(arr.shape, lambda i, nd=nd: (0,) * nd, buffers=1)

    out = pl.pallas_call(
        kernel,
        out_shape=jax.ShapeDtypeStruct((BC, E), jnp.float32),
        grid=(BC // bc_tile,),
        in_specs=[x_spec] + [const_spec(w) for w in weights] + [const_spec(expand)],
        out_specs=pl.BlockSpec((bc_tile, E), lambda i: (i, 0)),   # lane-dense store
        compiler_params=pltpu.CompilerParams(
            dimension_semantics=("parallel",),
            vmem_limit_bytes=vmem_limit),
    )(x_flat, *weights, expand)

    return out.reshape(B, C, E)


# --------------------------------------------------------------------------- #
# Pure-JAX reference + param init (mirrors the PyTorch forward)
# --------------------------------------------------------------------------- #
def attention_pool_ref(x, params, n_heads):
    wa1, ba1, wa2, ba2, wv1, bv1, wv2, bv2 = params
    B, C, Hs, Ws, E = x.shape
    x_use = x.reshape(B, C, Hs * Ws, E)
    logits = jnp.maximum(x_use @ wa1 + ba1[0], 0.0) @ wa2 + ba2[0]       # (B,C,S,H)
    attn = jax.nn.softmax(logits, axis=-2)
    emb = jnp.maximum(x_use @ wv1 + bv1[0], 0.0) @ wv2 + bv2[0]          # (B,C,S,E)
    emb = emb.reshape(emb.shape[:-1] + (n_heads, E // n_heads))          # (B,C,S,H,Dh)
    pooled = (attn[..., None] * emb).sum(axis=-3)                        # (B,C,H,Dh)
    return pooled.reshape(B, C, E)


def init_params(key, E, n_heads, hid_a, hid_v):
    ks = jax.random.split(key, 4)
    scale = 0.1
    wa1 = scale * jax.random.normal(ks[0], (E, hid_a), jnp.float32)
    ba1 = jnp.zeros((1, hid_a), jnp.float32)
    wa2 = scale * jax.random.normal(ks[1], (hid_a, n_heads), jnp.float32)
    ba2 = jnp.zeros((1, n_heads), jnp.float32)
    wv1 = scale * jax.random.normal(ks[2], (E, hid_v), jnp.float32)
    bv1 = jnp.zeros((1, hid_v), jnp.float32)
    wv2 = scale * jax.random.normal(ks[3], (hid_v, E), jnp.float32)
    bv2 = jnp.zeros((1, E), jnp.float32)
    return (wa1, ba1, wa2, ba2, wv1, bv1, wv2, bv2)


# --------------------------------------------------------------------------- #
if __name__ == "__main__":
    # Small but aligned demo shapes: S = 4*4 = 16 (multiple of 8), E = 128
    # (lane tile), BC = 16 -> bc_tile = 8, grid = 2 parallel steps.
    B, C, Hs, Ws, E = 2, 8, 4, 4, 128
    n_heads = 4
    hid_a, hid_v = 64, 64

    key = jax.random.PRNGKey(0)
    kx, kp = jax.random.split(key)
    x = jax.random.normal(kx, (B, C, Hs, Ws, E), jnp.float32)
    params = init_params(kp, E, n_heads, hid_a, hid_v)

    ref = attention_pool_ref(x, params, n_heads)

    # Default path: block-diag fused layer-2 (v6e/v7x), f32 matmuls -> exact.
    out = jax.block_until_ready(attention_pool(x, params, n_heads))
    assert out.shape == (B, C, E)
    assert jnp.allclose(out, ref, atol=1e-4, rtol=1e-4), "fused f32 mismatch"

    # v5e-style path: split layer-2 with hid_a padded to a lane tile.
    out_split = jax.block_until_ready(
        attention_pool(x, params, n_heads, fuse_layer2=False))
    assert jnp.allclose(out_split, ref, atol=1e-4, rtol=1e-4), "split f32 mismatch"

    # bf16 matmul operands (recommended on real chips); f32 accumulation.
    out_bf16 = jax.block_until_ready(
        attention_pool(x, params, n_heads, matmul_dtype=jnp.bfloat16))
    bf16_err = float(jnp.max(jnp.abs(out_bf16 - ref)))
    assert bf16_err < 1e-1, f"bf16 path diverged: max abs err {bf16_err}"

    print("KERNEL_OK")
</pallas_src>

<mosaic_0001>
module attributes {stable_mosaic.version = 11 : i64} {
  func.func @_attention_pool_kernel_fused(%arg0: i32, %arg1: memref<8x16x128xf32, #tpu.memory_space<vmem>>, %arg2: memref<128x128xf32, #tpu.memory_space<vmem>>, %arg3: memref<1x128xf32, #tpu.memory_space<vmem>>, %arg4: memref<128x132xf32, #tpu.memory_space<vmem>>, %arg5: memref<1x132xf32, #tpu.memory_space<vmem>>, %arg6: memref<4x128xf32, #tpu.memory_space<vmem>>, %arg7: memref<8x128xf32, #tpu.memory_space<vmem>>) attributes {dimension_semantics = [#tpu.dimension_semantics<parallel>], iteration_bounds = array<i64: 2>, scalar_prefetch = 0 : i64, scratch_operands = 0 : i64, tpu.core_type = #tpu.core_type<tc>, window_params = [{transform_indices = @transform_0, window_bounds = array<i64: 8, 16, 128>}, {pipeline_mode = #tpu.pipeline_mode<synchronous>, transform_indices = @transform_1, window_bounds = array<i64: 128, 128>}, {pipeline_mode = #tpu.pipeline_mode<synchronous>, transform_indices = @transform_2, window_bounds = array<i64: 1, 128>}, {pipeline_mode = #tpu.pipeline_mode<synchronous>, transform_indices = @transform_3, window_bounds = array<i64: 128, 132>}, {pipeline_mode = #tpu.pipeline_mode<synchronous>, transform_indices = @transform_4, window_bounds = array<i64: 1, 132>}, {pipeline_mode = #tpu.pipeline_mode<synchronous>, transform_indices = @transform_5, window_bounds = array<i64: 4, 128>}, {transform_indices = @transform_6, window_bounds = array<i64: 8, 128>}]} {
    %c0 = arith.constant 0 : index
    %c0_0 = arith.constant 0 : index
    %c0_1 = arith.constant 0 : index
    %0 = vector.load %arg1[%c0, %c0_0, %c0_1] : memref<8x16x128xf32, #tpu.memory_space<vmem>>, vector<8x16x128xf32>
    %1 = vector.shape_cast %0 : vector<8x16x128xf32> to vector<128x128xf32>
    %c0_2 = arith.constant 0 : index
    %c0_3 = arith.constant 0 : index
    %2 = vector.load %arg2[%c0_2, %c0_3] : memref<128x128xf32, #tpu.memory_space<vmem>>, vector<128x128xf32>
    %cst = arith.constant dense<0.000000e+00> : vector<128x128xf32>
    %3 = tpu.matmul %1, %2, %cst {dimension_numbers = #tpu.dot_dimension_numbers<[1], [0], [0], [1], [0, 0, 1, 1], [], []>} : vector<128x128xf32>, vector<128x128xf32>, vector<128x128xf32> -> vector<128x128xf32>
    %c0_4 = arith.constant 0 : index
    %c0_5 = arith.constant 0 : index
    %4 = vector.load %arg3[%c0_4, %c0_5] : memref<1x128xf32, #tpu.memory_space<vmem>>, vector<1x128xf32>
    %5 = vector.broadcast %4 : vector<1x128xf32> to vector<128x128xf32>
    %6 = arith.addf %3, %5 : vector<128x128xf32>
    %cst_6 = arith.constant 0.000000e+00 : f32
    %7 = vector.broadcast %cst_6 : f32 to vector<128x128xf32>
    %8 = arith.maximumf %6, %7 : vector<128x128xf32>
    %c0_7 = arith.constant 0 : index
    %c0_8 = arith.constant 0 : index
    %9 = vector.load %arg4[%c0_7, %c0_8] : memref<128x132xf32, #tpu.memory_space<vmem>>, vector<128x132xf32>
    %cst_9 = arith.constant dense<0.000000e+00> : vector<128x132xf32>
    %10 = tpu.matmul %8, %9, %cst_9 {dimension_numbers = #tpu.dot_dimension_numbers<[1], [0], [0], [1], [0, 0, 1, 1], [], []>} : vector<128x128xf32>, vector<128x132xf32>, vector<128x132xf32> -> vector<128x132xf32>
    %c0_10 = arith.constant 0 : index
    %c0_11 = arith.constant 0 : index
    %11 = vector.load %arg5[%c0_10, %c0_11] : memref<1x132xf32, #tpu.memory_space<vmem>>, vector<1x132xf32>
    %12 = vector.broadcast %11 : vector<1x132xf32> to vector<128x132xf32>
    %13 = arith.addf %10, %12 : vector<128x132xf32>
    %14 = vector.extract_strided_slice %13 {offsets = [0, 0], sizes = [128, 128], strides = [1, 1]} : vector<128x132xf32> to vector<128x128xf32>
    %15 = vector.extract_strided_slice %13 {offsets = [0, 128], sizes = [128, 4], strides = [1, 1]} : vector<128x132xf32> to vector<128x4xf32>
    %16 = vector.shape_cast %15 : vector<128x4xf32> to vector<8x16x4xf32>
    %17 = tpu.transpose %16, [0, 2, 1] : vector<8x16x4xf32> -> vector<8x4x16xf32>
    %cst_12 = arith.constant dense<0xFF800000> : vector<8x4xf32>
    %18 = vector.multi_reduction <maximumf>, %17, %cst_12 [2] : vector<8x4x16xf32> to vector<8x4xf32>
    %19 = vector.shape_cast %18 : vector<8x4xf32> to vector<8x4x1xf32>
    %20 = vector.broadcast %19 : vector<8x4x1xf32> to vector<8x4x16xf32>
    %21 = arith.subf %17, %20 : vector<8x4x16xf32>
    %22 = math.exp %21 : vector<8x4x16xf32>
    %cst_13 = arith.constant dense<0.000000e+00> : vector<8x4xf32>
    %23 = vector.multi_reduction <add>, %22, %cst_13 [2] : vector<8x4x16xf32> to vector<8x4xf32>
    %24 = vector.shape_cast %23 : vector<8x4xf32> to vector<8x4x1xf32>
    %25 = vector.shape_cast %14 : vector<128x128xf32> to vector<8x16x128xf32>
    "tpu.trace_start"() <{level = 10 : i32, message = "bhs,bse->bhe"}> : () -> ()
    %cst_14 = arith.constant dense<0.000000e+00> : vector<8x4x128xf32>
    %26 = tpu.matmul %22, %25, %cst_14 {dimension_numbers = #tpu.dot_dimension_numbers<[2], [1], [1], [2], [0, 0, 0, 1, 1, 2], [0], [0]>} : vector<8x4x16xf32>, vector<8x16x128xf32>, vector<8x4x128xf32> -> vector<8x4x128xf32>
    "tpu.trace_stop"() : () -> ()
    %cst_15 = arith.constant 1.000000e+00 : f32
    %27 = vector.broadcast %cst_15 : f32 to vector<8x4x1xf32>
    %28 = arith.divf %27, %24 : vector<8x4x1xf32>
    %29 = vector.broadcast %28 : vector<8x4x1xf32> to vector<8x4x128xf32>
    %30 = arith.mulf %26, %29 : vector<8x4x128xf32>
    %c0_16 = arith.constant 0 : index
    %c0_17 = arith.constant 0 : index
    %31 = vector.load %arg6[%c0_16, %c0_17] : memref<4x128xf32, #tpu.memory_space<vmem>>, vector<4x128xf32>
    %32 = vector.shape_cast %31 : vector<4x128xf32> to vector<1x4x128xf32>
    %33 = vector.broadcast %32 : vector<1x4x128xf32> to vector<8x4x128xf32>
    %34 = arith.mulf %30, %33 : vector<8x4x128xf32>
    %cst_18 = arith.constant dense<0.000000e+00> : vector<8x128xf32>
    %35 = vector.multi_reduction <add>, %34, %cst_18 [1] : vector<8x4x128xf32> to vector<8x128xf32>
    %c0_19 = arith.constant 0 : index
    %c0_20 = arith.constant 0 : index
    %36 = vector.load %arg7[%c0_19, %c0_20] : memref<8x128xf32, #tpu.memory_space<vmem>>, vector<8x128xf32>
    tpu.vector_store %arg7[%c0_19, %c0_20], %35 {strides = array<i32>} : memref<8x128xf32, #tpu.memory_space<vmem>>, vector<8x128xf32>,
    return
  }
  func.func @transform_0(%arg0: i32) -> (i32, i32, i32) {
    %c0_i32 = arith.constant 0 : i32
    %c0_i32_0 = arith.constant 0 : i32
    %c0_i32_1 = arith.constant 0 : i32
    return %arg0, %c0_i32, %c0_i32_0 : i32, i32, i32
  }
  func.func @transform_1(%arg0: i32) -> (i32, i32) {
    %c0_i32 = arith.constant 0 : i32
    %c0_i32_0 = arith.constant 0 : i32
    %c0_i32_1 = arith.constant 0 : i32
    return %c0_i32, %c0_i32_0 : i32, i32
  }
  func.func @transform_2(%arg0: i32) -> (i32, i32) {
    %c0_i32 = arith.constant 0 : i32
    %c0_i32_0 = arith.constant 0 : i32
    %c0_i32_1 = arith.constant 0 : i32
    return %c0_i32, %c0_i32_0 : i32, i32
  }
  func.func @transform_3(%arg0: i32) -> (i32, i32) {
    %c0_i32 = arith.constant 0 : i32
    %c0_i32_0 = arith.constant 0 : i32
    %c0_i32_1 = arith.constant 0 : i32
    return %c0_i32, %c0_i32_0 : i32, i32
  }
  func.func @transform_4(%arg0: i32) -> (i32, i32) {
    %c0_i32 = arith.constant 0 : i32
    %c0_i32_0 = arith.constant 0 : i32
    %c0_i32_1 = arith.constant 0 : i32
    return %c0_i32, %c0_i32_0 : i32, i32
  }
  func.func @transform_5(%arg0: i32) -> (i32, i32) {
    %c0_i32 = arith.constant 0 : i32
    %c0_i32_0 = arith.constant 0 : i32
    %c0_i32_1 = arith.constant 0 : i32
    return %c0_i32, %c0_i32_0 : i32, i32
  }
  func.func @transform_6(%arg0: i32) -> (i32, i32) {
    %c0_i32 = arith.constant 0 : i32
    %c0_i32_0 = arith.constant 0 : i32
    return %arg0, %c0_i32 : i32, i32
  }
}

</mosaic_0001>

<bundles_post_ra>
// kernel: tpu_custom_call.1
= control target key start
LH: loop header
LB: loop body
LE: loop exit
PB: predicated region body
PF: predicated region fallthrough
CT: control target
= control target key end

     0   :  { %11 = vsyncpa [#allocation3], 0  ;;  %s2693_s0 = inlined_call_operand.vmem [shape: f32[16,16,128], index: 0, kind: input, shape index: {}]   ;;  %s2694_s1 = inlined_call_operand.vmem [shape: f32[128,128], index: 1, kind: input, shape index: {}]   ;;  %s2695_s2 = inlined_call_operand.vmem [shape: f32[1,128], index: 2, kind: input, shape index: {}]   ;;  %s2696_s3 = inlined_call_operand.vmem [shape: f32[128,132], index: 3, kind: input, shape index: {}]   ;;  %s2697_s4 = inlined_call_operand.vmem [shape: f32[1,132], index: 4, kind: input, shape index: {}]   ;;  %s2698_s5 = inlined_call_operand.vmem [shape: f32[4,128], index: 5, kind: input, shape index: {}]   ;;  %s2699_s6 = inlined_call_operand.hbm [shape: f32[16,128], index: 6, kind: output, shape index: {}]  }
   0x1   :  { %13 = vsyncpa [#allocation3 + $0x1], 0  ;;  %s2216_s21 = smov 0   ;;  %s2218_s22 = smov 0  }
   0x2   :  { %s2220_s23 = smov 0   ;;  %s2222_s24 = smov 0  }
   0x3 LB: > { %s2237_s25 = sadd.s32 4294967295, %s2175_s24   ;;  %s1761_s26 = sadd.s32 4294967294, %s2175_s24   ;;  %s2175_s24 = sphi %s2222_s24, %s2705_s24   ;;  %s2171_s23 = sphi %s2220_s23, %s2704_s23   ;;  %s2167_s22 = sphi %s2218_s22, %s2703_s22   ;;  %s2163_s21 = sphi %s2216_s21, %s2702_s21  }
   0x4   : > { %s2241_s27 = sadd.s32 1, %s2175_s24   ;;  %s157_s28 = sadd.s32 1, %s2171_s23 }
   0x5   : > { %s154_s29 = ssub.s32 %s2175_s24, %s2241_s27  ;;  %p167_p0 = scmp.ne.s32.totalorder %s2171_s23, %s2167_s22 }
   0x6   : > { %p155_p1 = scmp.eq.s32.totalorder %s154_s29, 0  ;;  %p168_p2 = scmp.eq.s32.totalorder %s2237_s25, 1 }
   0x7   : > { %p173_p3 = scmp.ne.s32.totalorder %s2167_s22, %s2163_s21  ;;  %p174_p4 = scmp.eq.s32.totalorder %s1761_s26, 1 }
   0x8   : > { %s2252_s30 = scalar_select %p155_p1, %s2171_s23, %s157_s28  }
   0x9   : > { %p2254_p5 = por %p168_p2, %p167_p0  ;;  %p2258_p6 = por %p174_p4, %p173_p3 }
   0xa   : > { %p1764_p7 = scmp.ge.s32.totalorder %s2175_s24, 1  ;;  %p217_p8 = scmp.lt.s32.totalorder %s2175_s24, 3 }
   0xc   : > { %p218_p9 = pnand %p1764_p7, %p217_p8 }
   0xd   : > { %v271_v0 = vld [vmem:[%s2694_s1] sm:$0xff] (!%p218_p9)  ;;  %v272_v1 = vld [vmem:[%s2694_s1 + $0x8] sm:$0xff] (!%p218_p9)  ;;  %v273_v2 = vld [vmem:[%s2694_s1 + $0x10] sm:$0xff] (!%p218_p9)  ;;  %s1766_s15 = sshll.u32 (!%p218_p9), %s2237_s25, 3  ;;  %vm916_vm0 = vcmask (!%p218_p9), 125952   ;;  %vm2179_vm1 = vmmov (!%p218_p9), 0  }
   0xe   : > { %221 = sbr.rel (%p218_p9) target bundleno = 1067 (0x42b), region = 44  ;;  %v1951_v3 = vpack.c.bf16 (!%p218_p9), %v272_v1, %v271_v0  ;;  %v274_v4 = vld [vmem:[%s2694_s1 + $0x18] sm:$0xff] (!%p218_p9)  ;;  %p249_p10 = scmp.lt.s32.totalorder (!%p218_p9), %s1766_s15, 15  ;;  %v275_v6 = vld [vmem:[%s2694_s1 + $0x20] sm:$0xff] (!%p218_p9)  ;;  %v276_v7 = vld [vmem:[%s2694_s1 + $0x28] sm:$0xff] (!%p218_p9)  ;;  %vm989_vm2 = vcmask (!%p218_p9), 130048  }
   0xf   : > { %v1955_v5 = vpack.c.bf16 (!%p218_p9), %v274_v4, %v273_v2  ;;  %v1959_v8 = vpack.c.bf16 (!%p218_p9), %v276_v7, %v275_v6  ;;  %v277_v9 = vld [vmem:[%s2694_s1 + $0x30] sm:$0xff] (!%p218_p9)  ;;  %v456_v10 = vld [vmem:[%s2696_s3 + $0x8] sm:$0xff] (!%p218_p9)  ;;  %v458_v11 = vld [vmem:[%s2696_s3 + $0x18] sm:$0xff] (!%p218_p9)  ;;  %vm1607_vm3 = vcmask (!%p218_p9), 1043456   ;;  %vm1672_vm4 = vcmask (!%p218_p9), 1041409   ;;  %s245_s16 = sand.u32 (!%p218_p9), 1, %s2167_s22  }
  0x10   : > { %1952 = vmatprep.subr.bf16.mxu0 (!%p218_p9), %v1951_v3  ;;  %v278_v12 = vld [vmem:[%s2694_s1 + $0x38] sm:$0xff] (!%p218_p9)  ;;  %v1983_v13 = vpack.c.bf16 (!%p218_p9), %v458_v11, %v456_v10  ;;  %v455_v14 = vld [vmem:[%s2696_s3] sm:$0xff] (!%p218_p9)  ;;  %v457_v15 = vld [vmem:[%s2696_s3 + $0x10] sm:$0xff] (!%p218_p9)  ;;  %vm1674_vm5 = vcmask (!%p218_p9), 1042434   ;;  %vm1676_vm6 = vcmask (!%p218_p9), 1043459   ;;  %vm1678_vm7 = vcmask (!%p218_p9), 1044484  }
  0x11   : > { %1954 = vmatpush3.bf16.msra.mxu0 (!%p218_p9), %v1951_v3  ;;  %v1985_v17 = vpack.c.bf16 (!%p218_p9), %v457_v15, %v455_v14  ;;  %v1963_v18 = vpack.c.bf16 (!%p218_p9), %v278_v12, %v277_v9  ;;  %v279_v19 = vld [vmem:[%s2694_s1 + $0x40] sm:$0xff] (!%p218_p9)  ;;  %v280_v20 = vld [vmem:[%s2694_s1 + $0x48] sm:$0xff] (!%p218_p9)  ;;  %v281_v22 = vld [vmem:[%s2694_s1 + $0x50] sm:$0xff] (!%p218_p9)  ;;  %vm1680_vm8 = vcmask (!%p218_p9), 1045509   ;;  %vm1682_vm9 = vcmask (!%p218_p9), 1046534   ;;  %s1765_s17 = sshll.u32 (!%p218_p9), %s245_s16, 3 }
  0x12   : > { %1956 = vmatprep.subr.bf16.mxu0 (!%p218_p9), %v1955_v5  ;;  %1984 = vmatprep.subr.bf16.mxu1 (!%p218_p9), %v1983_v13  ;;  %v460_v21 = vld [vmem:[%s2696_s3 + $0x28] sm:$0xff] (!%p218_p9)  ;;  %v282_v23 = vld [vmem:[%s2694_s1 + $0x58] sm:$0xff] (!%p218_p9)  ;;  %v459_v25 = vld [vmem:[%s2696_s3 + $0x20] sm:$0xff] (!%p218_p9)  ;;  %v1967_v26 = vpack.c.bf16 (!%p218_p9), %v280_v20, %v279_v19  ;;  %s1779_s18 = sshll.u32 (!%p218_p9), %s2237_s25, 7  ;;  %vm1684_vm10 = vcmask (!%p218_p9), 1047559   ;;  %s2180_s25 = smov (!%p218_p9), [#allocation2]  }
  0x13   : > { %1986 = vmatpush1.bf16.msra.mxu1 (!%p218_p9), %v1985_v17  ;;  %v462_v24 = vld [vmem:[%s2696_s3 + $0x38] sm:$0xff] (!%p218_p9)  ;;  %v461_v28 = vld [vmem:[%s2696_s3 + $0x30] sm:$0xff] (!%p218_p9)  ;;  %v464_v29 = vld [vmem:[%s2696_s3 + $0x48] sm:$0xff] (!%p218_p9)  ;;  %v1971_v38 = vpack.c.bf16 (!%p218_p9), %v282_v23, %v281_v22  ;;  %s2651_s29 = scalar_lea.hbm (!%p218_p9), %s2699_s6, %s1779_s18  ;;  %s2117_s10 = sshll.u32 (!%p218_p9), %s2180_s25, 4  ;;  %s2118_s10 = int_to_ptr.vmem [resolvable:$false] %s2117_s10 }
  0x14   : > { %v1987_v27 = vpack.c.bf16 (!%p218_p9), %v462_v24, %v460_v21  ;;  %v466_v30 = vld [vmem:[%s2696_s3 + $0x58] sm:$0xff] (!%p218_p9)  ;;  %v1989_v31 = vpack.c.bf16 (!%p218_p9), %v461_v28, %v459_v25  ;;  %v463_v33 = vld [vmem:[%s2696_s3 + $0x40] sm:$0xff] (!%p218_p9)  ;;  %v465_v34 = vld [vmem:[%s2696_s3 + $0x50] sm:$0xff] (!%p218_p9)  ;;  %v2177_v24 = vmov (!%p218_p9), 0.0   ;;  %s2119_s11 = scalar_lea.vmem (!%p218_p9), %s2118_s10, 256 }
  0x15   : > { %s2707_s15 = smov (!%p249_p10, %s1766_s15), 15  ;;  %1958 = vmatpush3.bf16.msra.mxu0 %v1955_v5  ;;  %v1991_v32 = vpack.c.bf16 %v466_v30, %v464_v29  ;;  %v468_v35 = vld [vmem:[%s2696_s3 + $0x68] sm:$0xff]  ;;  %v470_v36 = vld [vmem:[%s2696_s3 + $0x78] sm:$0xff]  ;;  %v1993_v37 = vpack.c.bf16 %v465_v34, %v463_v33  ;;  %v283_v39 = vld [vmem:[%s2694_s1 + $0x60] sm:$0xff]  ;;  %563 = vmatprep.mubr.f32.mxu1 %v2177_v24 }
  0x16   : > { %s1782_s9 = sshll.u32 %s2707_s15, 4  ;;  %1960 = vmatprep.subr.bf16.mxu0 %v1959_v8  ;;  %1988 = vmatprep.subr.bf16.mxu1 %v1987_v27  ;;  %v1995_v40 = vpack.c.bf16 %v470_v36, %v468_v35  ;;  %v467_v41 = vld [vmem:[%s2696_s3 + $0x60] sm:$0xff]  ;;  %v469_v42 = vld [vmem:[%s2696_s3 + $0x70] sm:$0xff]  ;;  %v284_v43 = vld [vmem:[%s2694_s1 + $0x68] sm:$0xff]  ;;  %s247_s15 = scalar_lea.vmem [#allocation2], %s1765_s17 }
  0x17   : > { %s2298_s19 = scalar_lea.vmem %s2693_s0, %s1782_s9  ;;  %1990 = vmatpush1.bf16.msra.mxu1 %v1989_v31  ;;  %v472_v44 = vld [vmem:[%s2696_s3 + $0x88] sm:$0xff]  ;;  %v474_v45 = vld [vmem:[%s2696_s3 + $0x98] sm:$0xff]  ;;  %v1997_v46 = vpack.c.bf16 %v469_v42, %v467_v41  ;;  %v1975_v47 = vpack.c.bf16 %v284_v43, %v283_v39  ;;  %v285_v48 = vld [vmem:[%s2694_s1 + $0x70] sm:$0xff]  ;;  %s1702_s20 = sshll.u32 %s247_s15, 4  ;;  %s2653_s20 = int_to_ptr.vmem [resolvable:$true] %s1702_s20 }
  0x18   : > { %v255_v16 = vld [vmem:[%s2298_s19] sm:$0xff]  ;;  %1992 = vmatprep.subr.bf16.mxu1 %v1991_v32  ;;  %v1999_v49 = vpack.c.bf16 %v474_v45, %v472_v44  ;;  %v473_v51 = vld [vmem:[%s2696_s3 + $0x90] sm:$0xff]  ;;  %v286_v52 = vld [vmem:[%s2694_s1 + $0x78] sm:$0xff]  ;;  %s1689_s9 = scalar_lea.sflag [#allocation3], %s245_s16  ;;  %p2120_p0 = scmp.lt.s32.totalorder %s2653_s20, %s2118_s10 }
  0x19   : > { %1871 = vmatprep.mubr.f32.mxu0 %v255_v16  ;;  %1962 = vmatpush3.bf16.msra.mxu0 %v1959_v8  ;;  %v471_v50 = vld [vmem:[%s2696_s3 + $0x80] sm:$0xff]  ;;  %v476_v53 = vld [vmem:[%s2696_s3 + $0xa8] sm:$0xff]  ;;  %v478_v54 = vld [vmem:[%s2696_s3 + $0xb8] sm:$0xff]  ;;  %v1979_v56 = vpack.c.bf16 %v286_v52, %v285_v48 }
  0x1a   : > { %1964 = vmatprep.subr.bf16.mxu0 %v1963_v18  ;;  %v2001_v55 = vpack.c.bf16 %v473_v51, %v471_v50  ;;  %v2003_v57 = vpack.c.bf16 %v478_v54, %v476_v53  ;;  %v475_v58 = vld [vmem:[%s2696_s3 + $0xa0] sm:$0xff]  ;;  %v477_v59 = vld [vmem:[%s2696_s3 + $0xb0] sm:$0xff]  ;;  %v480_v60 = vld [vmem:[%s2696_s3 + $0xc8] sm:$0xff] }
  0x1b   : > { %1994 = vmatpush1.bf16.msra.mxu1 %v1993_v37  ;;  %v482_v61 = vld [vmem:[%s2696_s3 + $0xd8] sm:$0xff]  ;;  %v2005_v62 = vpack.c.bf16 %v477_v59, %v475_v58  ;;  %v479_v0 = vld [vmem:[%s2696_s3 + $0xc0] sm:$0xff]  ;;  %v481_v1 = vld [vmem:[%s2696_s3 + $0xd0] sm:$0xff] }
  0x1c   : > { %1996 = vmatprep.subr.bf16.mxu1 %v1995_v40  ;;  %v2007_v63 = vpack.c.bf16 %v482_v61, %v480_v60  ;;  %v256_v2 = vld [vmem:[%s2298_s19 + $0x8] sm:$0xff]  ;;  %v2009_v3 = vpack.c.bf16 %v481_v1, %v479_v0  ;;  %v257_v4 = vld [vmem:[%s2298_s19 + $0x10] sm:$0xff]  ;;  %v258_v5 = vld [vmem:[%s2298_s19 + $0x18] sm:$0xff] }
  0x1d   : > { %1966 = vmatpush3.bf16.msra.mxu0 %v1963_v18  ;;  %v259_v6 = vld [vmem:[%s2298_s19 + $0x20] sm:$0xff]  ;;  %v260_v7 = vld [vmem:[%s2298_s19 + $0x28] sm:$0xff]  ;;  %v261_v8 = vld [vmem:[%s2298_s19 + $0x30] sm:$0xff] }
  0x1e   : > { %1968 = vmatprep.subr.bf16.mxu0 %v1967_v26  ;;  %v262_v9 = vld [vmem:[%s2298_s19 + $0x38] sm:$0xff]  ;;  %v263_v10 = vld [vmem:[%s2298_s19 + $0x40] sm:$0xff]  ;;  %v264_v11 = vld [vmem:[%s2298_s19 + $0x48] sm:$0xff] }
  0x1f   : > { %1998 = vmatpush1.bf16.msra.mxu1 %v1997_v46  ;;  %v265_v12 = vld [vmem:[%s2298_s19 + $0x50] sm:$0xff]  ;;  %v266_v13 = vld [vmem:[%s2298_s19 + $0x58] sm:$0xff]  ;;  %v267_v14 = vld [vmem:[%s2298_s19 + $0x60] sm:$0xff] }
  0x20   : > { %2000 = vmatprep.subr.bf16.mxu1 %v1999_v49  ;;  %v268_v15 = vld [vmem:[%s2298_s19 + $0x68] sm:$0xff]  ;;  %v269_v16 = vld [vmem:[%s2298_s19 + $0x70] sm:$0xff]  ;;  %v270_v17 = vld [vmem:[%s2298_s19 + $0x78] sm:$0xff]  ;;  %s2113_s19 = scalar_lea.vmem %s2653_s20, 128 }
  0x21   : > { %1970 = vmatpush3.bf16.msra.mxu0 %v1967_v26  ;;  %v484_v18 = vld [vmem:[%s2696_s3 + $0xe8] sm:$0xff]  ;;  %v486_v19 = vld [vmem:[%s2696_s3 + $0xf8] sm:$0xff]  ;;  %v483_v21 = vld [vmem:[%s2696_s3 + $0xe0] sm:$0xff]  ;;  %p2114_p11 = scmp.ne.s32.totalorder %s2653_s20, %s2113_s19  ;;  %p2121_p1 = scmp.lt.s32.totalorder %s2119_s11, %s2113_s19 }
  0x22   : > { %1972 = vmatprep.subr.bf16.mxu0 %v1971_v38  ;;  %v2011_v20 = vpack.c.bf16 %v486_v19, %v484_v18  ;;  %v485_v22 = vld [vmem:[%s2696_s3 + $0xf0] sm:$0xff]  ;;  %v2434_v25 = vld [vmem:[%s2695_s2] ss:$0 sm:$0xff] }
  0x23   : > { %2002 = vmatpush1.bf16.msra.mxu1 %v2001_v55  ;;  %v2013_v23 = vpack.c.bf16 %v485_v22, %v483_v21  ;;  %p2115_p12 = pnand %p2114_p11, %p2254_p5  ;;  %p2122_p2 = por %p2121_p1, %p2120_p0 }
  0x24   : > { %2004 = vmatprep.subr.bf16.mxu1 %v2003_v57 }
  0x25   : > { %1974 = vmatpush3.bf16.msra.mxu0 %v1971_v38  ;;  %p2116_p13 = pneg %p2115_p12 }
  0x26   : > { %1976 = vmatprep.subr.bf16.mxu0 %v1975_v47 }
  0x27   : > { %2006 = vmatpush1.bf16.msra.mxu1 %v2005_v62  ;;  %p2123_p3 = pnand %p2122_p2, %p2116_p13 }
  0x28   : > { %2008 = vmatprep.subr.bf16.mxu1 %v2007_v63 }
  0x29   : > { %1978 = vmatpush3.bf16.msra.mxu0 %v1975_v47 }
  0x2a   : > { %1980 = vmatprep.subr.bf16.mxu0 %v1979_v56 }
  0x2b   : > { %2010 = vmatpush1.bf16.msra.mxu1 %v2009_v3 }
  0x2c   : > { %2012 = vmatprep.subr.bf16.mxu1 %v2011_v20 }
  0x2d   : > { %1982 = vmatpush3.bf16.msra.mxu0 %v1979_v56 }
  0x2f   : > { %2014 = vmatpush1.bf16.msra.mxu1 %v2013_v23 }
  0x30   : > { %1872 = vmatmul.mubr.f32.vlgmr.msra.gmra.mrb[0].mxu0 %v256_v2 }
  0x31   : > { %1874 = vmatprep.mubr.f32.mxu0 %v257_v4 }
  0x34   : > { %1875 = vmatmul.mubr.f32.gmra.mrb[2].mxu0 %v258_v5 }
  0x35   : > { %1877 = vmatprep.mubr.f32.mxu0 %v259_v6 }
  0x38   : > { %1878 = vmatmul.mubr.f32.gmra.mrb[4].mxu0 %v260_v7 }
  0x39   : > { %1880 = vmatprep.mubr.f32.mxu0 %v261_v8 }
  0x3c   : > { %1881 = vmatmul.mubr.f32.gmra.mrb[6].mxu0 %v262_v9 }
  0x3d   : > { %1883 = vmatprep.mubr.f32.mxu0 %v263_v10  ;;  %v2178_v10 = vmov 0.0|0.0  }
  0x3e   : > { %2015 = vmatprep.subr.bf16.mxu0 %v2178_v10 }
  0x40   : > { %1884 = vmatmul.mubr.f32.gmra.mrb[8].mxu0 %v264_v11  ;;  %v489_v11 = vlaneseq }
  0x41   : > { %1886 = vmatprep.mubr.f32.mxu0 %v265_v12 }
  0x42   : > { %v490_v12 = vshrl.u32 %v489_v11, 7 }
  0x44   : > { %1887 = vmatmul.mubr.f32.gmra.mrb[10].mxu0 %v266_v13  ;;  %v495_v13 = vsub.s32 1, %v490_v12 }
  0x45   : > { %1889 = vmatprep.mubr.f32.mxu0 %v267_v14  ;;  %v487_v14 = vld [vmem:[%s2697_s4] sm:$0x3] }
  0x48   : > { %1890 = vmatmul.mubr.f32.gmra.mrb[12].mxu0 %v268_v15  ;;  %v491_v15 = vsub.s32 0, %v490_v12 }
  0x49   : > { %1892 = vmatprep.mubr.f32.mxu0 %v269_v16  ;;  %v2471_v16 = vrot.slane %v487_v14, %v495_v13 }
  0x4a   : > { %v2473_v18 = vrot.slane %v487_v14, %v491_v15 }
  0x4c   : > { %1893 = vmatmul.mubr.f32.gmra.mrb[14].mxu0 %v270_v17 }
  0x4d   : > { %1899 = vmatprep.mubr.msk.f32.mxu0 %vm2179_vm1, %v2177_v24 }
 0x103   : > { %v1873_v26 = vpop.f32.mrb[0].mxu0 }
 0x104   : > { %v360_v27 = vpop.f32.mrb[1].mxu0  ;;  %v366_v29 = vadd.f32 %v1873_v26, %v2434_v25 }
 0x105   : > { %v361_v28 = vadd.f32 %v2434_v25, %v360_v27 }
 0x106   : > { %v440_v34 = vmax.f32 %v366_v29, 0.0 }
 0x107   : > { %v439_v30 = vmax.f32 %v361_v28, 0.0  ;;  %v1876_v31 = vpop.f32.mrb[2].mxu0 }
 0x108   : > { %v370_v32 = vpop.f32.mrb[3].mxu0  ;;  %v376_v38 = vadd.f32 %v1876_v31, %v2434_v25 }
 0x109   : > { %564 = vmatmul.mubr.f32.vlgmr.msra.gmra.mrb[0].mxu1 %v439_v30  ;;  %v371_v33 = vadd.f32 %v2434_v25, %v370_v32 }
 0x10a   : > { %569 = vmatprep.mubr.f32.mxu1 %v2177_v24  ;;  %v442_v42 = vmax.f32 %v376_v38, 0.0 }
 0x10b   : > { %v1879_v35 = vpop.f32.mrb[4].mxu0  ;;  %v441_v37 = vmax.f32 %v371_v33, 0.0 }
 0x10c   : > { %v380_v36 = vpop.f32.mrb[5].mxu0  ;;  %v386_v46 = vadd.f32 %v1879_v35, %v2434_v25 }
 0x10d   : > { %570 = vmatmul.mubr.f32.gmra.mrb[2].mxu1 %v440_v34  ;;  %v381_v41 = vadd.f32 %v2434_v25, %v380_v36 }
 0x10e   : > { %575 = vmatprep.mubr.f32.mxu1 %v2177_v24  ;;  %v444_v50 = vmax.f32 %v386_v46, 0.0 }
 0x10f   : > { %v1882_v39 = vpop.f32.mrb[6].mxu0  ;;  %v443_v45 = vmax.f32 %v381_v41, 0.0 }
 0x110   : > { %v390_v40 = vpop.f32.mrb[7].mxu0  ;;  %v396_v54 = vadd.f32 %v1882_v39, %v2434_v25 }
 0x111   : > { %576 = vmatmul.mubr.f32.gmra.mrb[4].mxu1 %v441_v37  ;;  %v391_v49 = vadd.f32 %v2434_v25, %v390_v40 }
 0x112   : > { %581 = vmatprep.mubr.f32.mxu1 %v2177_v24  ;;  %v446_v58 = vmax.f32 %v396_v54, 0.0 }
 0x113   : > { %v1885_v43 = vpop.f32.mrb[8].mxu0  ;;  %v445_v53 = vmax.f32 %v391_v49, 0.0 }
 0x114   : > { %v400_v44 = vpop.f32.mrb[9].mxu0  ;;  %v406_v60 = vadd.f32 %v1885_v43, %v2434_v25 }
 0x115   : > { %582 = vmatmul.mubr.f32.gmra.mrb[6].mxu1 %v442_v42  ;;  %v401_v57 = vadd.f32 %v2434_v25, %v400_v44 }
 0x116   : > { %587 = vmatprep.mubr.f32.mxu1 %v2177_v24  ;;  %v448_v62 = vmax.f32 %v406_v60, 0.0 }
 0x117   : > { %v1888_v47 = vpop.f32.mrb[10].mxu0  ;;  %v447_v59 = vmax.f32 %v401_v57, 0.0 }
 0x118   : > { %v410_v48 = vpop.f32.mrb[11].mxu0  ;;  %v416_v0 = vadd.f32 %v1888_v47, %v2434_v25 }
 0x119   : > { %588 = vmatmul.mubr.f32.gmra.mrb[8].mxu1 %v443_v45  ;;  %v411_v61 = vadd.f32 %v2434_v25, %v410_v48 }
 0x11a   : > { %593 = vmatprep.mubr.f32.mxu1 %v2177_v24  ;;  %v450_v2 = vmax.f32 %v416_v0, 0.0 }
 0x11b   : > { %v1891_v51 = vpop.f32.mrb[12].mxu0  ;;  %v449_v63 = vmax.f32 %v411_v61, 0.0 }
 0x11c   : > { %v420_v52 = vpop.f32.mrb[13].mxu0  ;;  %v426_v4 = vadd.f32 %v1891_v51, %v2434_v25 }
 0x11d   : > { %594 = vmatmul.mubr.f32.gmra.mrb[10].mxu1 %v444_v50  ;;  %v421_v1 = vadd.f32 %v2434_v25, %v420_v52 }
 0x11e   : > { %599 = vmatprep.mubr.f32.mxu1 %v2177_v24  ;;  %v452_v6 = vmax.f32 %v426_v4, 0.0 }
 0x11f   : > { %v1894_v55 = vpop.f32.mrb[14].mxu0  ;;  %v451_v3 = vmax.f32 %v421_v1, 0.0 }
 0x120   : > { %v430_v56 = vpop.f32.mrb[15].mxu0  ;;  %v436_v8 = vadd.f32 %v1894_v55, %v2434_v25 }
 0x121   : > { %600 = vmatmul.mubr.f32.gmra.mrb[12].mxu1 %v445_v53  ;;  %v431_v5 = vadd.f32 %v2434_v25, %v430_v56 }
 0x122   : > { %605 = vmatprep.mubr.f32.mxu1 %v2177_v24  ;;  %v454_v9 = vmax.f32 %v436_v8, 0.0 }
 0x123   : > { %v453_v7 = vmax.f32 %v431_v5, 0.0 }
 0x125   : > { %606 = vmatmul.mubr.f32.gmra.mrb[14].mxu1 %v446_v58 }
 0x126   : > { %611 = vmatprep.mubr.f32.mxu1 %v2177_v24 }
 0x129   : > { %612 = vmatmul.mubr.f32.gmra.mrb[16].mxu1 %v447_v59 }
 0x12a   : > { %617 = vmatprep.mubr.f32.mxu1 %v2177_v24 }
 0x12d   : > { %618 = vmatmul.mubr.f32.gmra.mrb[18].mxu1 %v448_v62 }
 0x12e   : > { %623 = vmatprep.mubr.f32.mxu1 %v2177_v24 }
 0x131   : > { %624 = vmatmul.mubr.f32.gmra.mrb[20].mxu1 %v449_v63 }
 0x132   : > { %629 = vmatprep.mubr.f32.mxu1 %v2177_v24 }
 0x135   : > { %630 = vmatmul.mubr.f32.gmra.mrb[22].mxu1 %v450_v2 }
 0x136   : > { %635 = vmatprep.mubr.f32.mxu1 %v2177_v24 }
 0x139   : > { %636 = vmatmul.mubr.f32.gmra.mrb[24].mxu1 %v451_v3 }
 0x13a   : > { %641 = vmatprep.mubr.f32.mxu1 %v2177_v24 }
 0x13d   : > { %642 = vmatmul.mubr.f32.gmra.mrb[26].mxu1 %v452_v6 }
 0x13e   : > { %647 = vmatprep.mubr.f32.mxu1 %v2177_v24 }
 0x141   : > { %648 = vmatmul.mubr.f32.gmra.mrb[28].mxu1 %v453_v7 }
 0x142   : > { %653 = vmatprep.mubr.f32.mxu1 %v2177_v24 }
 0x145   : > { %654 = vmatmul.mubr.f32.gmra.mrb[30].mxu1 %v454_v9 }
 0x1dc   : > { %v565_v17 = vpop.f32.mrb[0].mxu1 }
 0x1dd   : > { %v567_v19 = vpop.f32.mrb[1].mxu1  ;;  %v566_v22 = vadd.f32 %v565_v17, %v2473_v18 }
 0x1de   : > { %v568_v20 = vadd.f32 %v567_v19, %v2471_v16 }
 0x1e0   : > { %v571_v21 = vpop.f32.mrb[2].mxu1  ;;  %660 = vxpose.xlu0.b32.start [1/2] (short) (narrow) %v568_v20, 8 }
 0x1e1   : > { %v572_v23 = vadd.f32 %v571_v21, %v2473_v18  ;;  %v573_v25 = vpop.f32.mrb[3].mxu1 }
 0x1e2   : > { %v574_v26 = vadd.f32 %v573_v25, %v2471_v16 }
 0x1e3   : > { %v2016_v27 = vpack.c.bf16 %v572_v23, %v566_v22 }
 0x1e4   : > { %v577_v28 = vpop.f32.mrb[4].mxu1  ;;  %661 = vxpose.xlu0.b32.end [2/2] (short) (narrow) %v574_v26, 8 }
 0x1e5   : > { %v2480_v29 = vadd.f32 %v577_v28, %v2473_v18  ;;  %v579_v30 = vpop.f32.mrb[5].mxu1  ;;  %2017 = vmatpush3.bf16.msra.mxu0 %v2016_v27 }
 0x1e6   : > { %v580_v31 = vadd.f32 %v579_v30, %v2471_v16  ;;  %2018 = vmatprep.subr.bf16.mxu0 %v2178_v10 }
 0x1e8   : > { %v583_v32 = vpop.f32.mrb[6].mxu1  ;;  %692 = vxpose.xlu1.b32.start [1/2] (short) (narrow) %v580_v31, 8 }
 0x1e9   : > { %v2485_v33 = vadd.f32 %v583_v32, %v2473_v18  ;;  %v585_v34 = vpop.f32.mrb[7].mxu1 }
 0x1ea   : > { %v586_v35 = vadd.f32 %v585_v34, %v2471_v16 }
 0x1eb   : > { %v2019_v36 = vpack.c.bf16 %v2485_v33, %v2480_v29 }
 0x1ec   : > { %v589_v37 = vpop.f32.mrb[8].mxu1  ;;  %693 = vxpose.xlu1.b32.end [2/2] (short) (narrow) %v586_v35, 8 }
 0x1ed   : > { %v2491_v38 = vadd.f32 %v589_v37, %v2473_v18  ;;  %v591_v39 = vpop.f32.mrb[9].mxu1 }
 0x1ee   : > { %v592_v40 = vadd.f32 %v591_v39, %v2471_v16 }
 0x1f0   : > { %v595_v41 = vpop.f32.mrb[10].mxu1  ;;  %724 = vxpose.xlu0.b32.start [1/2] (short) (narrow) %v592_v40, 8 }
 0x1f1   : > { %v2495_v42 = vadd.f32 %v595_v41, %v2473_v18  ;;  %v597_v43 = vpop.f32.mrb[11].mxu1 }
 0x1f2   : > { %v598_v44 = vadd.f32 %v597_v43, %v2471_v16 }
 0x1f3   : > { %v2022_v45 = vpack.c.bf16 %v2495_v42, %v2491_v38 }
 0x1f4   : > { %v601_v46 = vpop.f32.mrb[12].mxu1  ;;  %725 = vxpose.xlu0.b32.end [2/2] (short) (narrow) %v598_v44, 8 }
 0x1f5   : > { %v2501_v47 = vadd.f32 %v601_v46, %v2473_v18  ;;  %v603_v48 = vpop.f32.mrb[13].mxu1 }
 0x1f6   : > { %v604_v49 = vadd.f32 %v603_v48, %v2471_v16 }
 0x1f8   : > { %v607_v50 = vpop.f32.mrb[14].mxu1  ;;  %756 = vxpose.xlu1.b32.start [1/2] (short) (narrow) %v604_v49, 8 }
 0x1f9   : > { %v2505_v51 = vadd.f32 %v607_v50, %v2473_v18  ;;  %v609_v52 = vpop.f32.mrb[15].mxu1 }
 0x1fa   : > { %v610_v53 = vadd.f32 %v609_v52, %v2471_v16 }
 0x1fb   : > { %v2025_v54 = vpack.c.bf16 %v2505_v51, %v2501_v47 }
 0x1fc   : > { %v613_v55 = vpop.f32.mrb[16].mxu1  ;;  %757 = vxpose.xlu1.b32.end [2/2] (short) (narrow) %v610_v53, 8 }
 0x1fd   : > { %v2511_v56 = vadd.f32 %v613_v55, %v2473_v18  ;;  %v615_v57 = vpop.f32.mrb[17].mxu1 }
 0x1fe   : > { %v616_v58 = vadd.f32 %v615_v57, %v2471_v16 }
 0x200   : > { %v619_v59 = vpop.f32.mrb[18].mxu1  ;;  %788 = vxpose.xlu0.b32.start [1/2] (short) (narrow) %v616_v58, 8 }
 0x201   : > { %v2515_v60 = vadd.f32 %v619_v59, %v2473_v18  ;;  %v621_v61 = vpop.f32.mrb[19].mxu1 }
 0x202   : > { %v622_v62 = vadd.f32 %v621_v61, %v2471_v16 }
 0x203   : > { %v2028_v63 = vpack.c.bf16 %v2515_v60, %v2511_v56 }
 0x204   : > { %v625_v0 = vpop.f32.mrb[20].mxu1  ;;  %789 = vxpose.xlu0.b32.end [2/2] (short) (narrow) %v622_v62, 8 }
 0x205   : > { %v2521_v1 = vadd.f32 %v625_v0, %v2473_v18  ;;  %v627_v2 = vpop.f32.mrb[21].mxu1 }
 0x206   : > { %v628_v3 = vadd.f32 %v627_v2, %v2471_v16 }
 0x208   : > { %v631_v4 = vpop.f32.mrb[22].mxu1  ;;  %820 = vxpose.xlu1.b32.start [1/2] (short) (narrow) %v628_v3, 8 }
 0x209   : > { %v2525_v5 = vadd.f32 %v631_v4, %v2473_v18  ;;  %v633_v6 = vpop.f32.mrb[23].mxu1 }
 0x20a   : > { %v634_v7 = vadd.f32 %v633_v6, %v2471_v16 }
 0x20b   : > { %v2031_v8 = vpack.c.bf16 %v2525_v5, %v2521_v1 }
 0x20c   : > { %v637_v9 = vpop.f32.mrb[24].mxu1  ;;  %821 = vxpose.xlu1.b32.end [2/2] (short) (narrow) %v634_v7, 8 }
 0x20d   : > { %v2531_v11 = vadd.f32 %v637_v9, %v2473_v18  ;;  %v639_v12 = vpop.f32.mrb[25].mxu1 }
 0x20e   : > { %v640_v13 = vadd.f32 %v639_v12, %v2471_v16 }
 0x210   : > { %v643_v14 = vpop.f32.mrb[26].mxu1  ;;  %852 = vxpose.xlu0.b32.start [1/2] (short) (narrow) %v640_v13, 8 }
 0x211   : > { %v2535_v15 = vadd.f32 %v643_v14, %v2473_v18  ;;  %v645_v17 = vpop.f32.mrb[27].mxu1 }
 0x212   : > { %v646_v19 = vadd.f32 %v645_v17, %v2471_v16 }
 0x213   : > { %v2034_v20 = vpack.c.bf16 %v2535_v15, %v2531_v11 }
 0x214   : > { %v649_v21 = vpop.f32.mrb[28].mxu1  ;;  %853 = vxpose.xlu0.b32.end [2/2] (short) (narrow) %v646_v19, 8 }
 0x215   : > { %v2541_v22 = vadd.f32 %v649_v21, %v2473_v18  ;;  %v651_v23 = vpop.f32.mrb[29].mxu1 }
 0x216   : > { %v652_v25 = vadd.f32 %v651_v23, %v2471_v16 }
 0x218   : > { %v655_v26 = vpop.f32.mrb[30].mxu1  ;;  %884 = vxpose.xlu1.b32.start [1/2] (short) (narrow) %v652_v25, 8 }
 0x219   : > { %v2545_v27 = vadd.f32 %v655_v26, %v2473_v18  ;;  %v657_v28 = vpop.f32.mrb[31].mxu1 }
 0x21a   : > { %v658_v30 = vadd.f32 %v657_v28, %v2471_v16 }
 0x21b   : > { %v2037_v31 = vpack.c.bf16 %v2545_v27, %v2541_v22  ;;  %v2628_v22 = vld [vmem:[%s2698_s5] sm:$0xf] }
 0x21c   : > { %885 = vxpose.xlu1.b32.end [2/2] (short) (narrow) %v658_v30, 8 }
 0x260   : > { %v676_v32 = vpop.trf.xlu0 }
 0x261   : > { %v917_v34 = vsel %vm916_vm0, %v676_v32, -inf }
 0x262   : > { %918 = vmax.xlane.f32.xlu0 %v917_v34 }
 0x268   : > { %v708_v35 = vpop.trf.xlu1 }
 0x269   : > { %v920_v37 = vsel %vm916_vm0, %v708_v35, -inf }
 0x26a   : > { %921 = vmax.xlane.f32.xlu1 %v920_v37 }
 0x270   : > { %v740_v39 = vpop.trf.xlu0 }
 0x271   : > { %v923_v18 = vsel %vm916_vm0, %v740_v39, -inf }
 0x272   : > { %924 = vmax.xlane.f32.xlu1 %v923_v18 }
 0x278   : > { %v772_v40 = vpop.trf.xlu1 }
 0x279   : > { %v926_v16 = vsel %vm916_vm0, %v772_v40, -inf }
 0x27a   : > { %927 = vmax.xlane.f32.xlu1 %v926_v16 }
 0x280   : > { %v804_v41 = vpop.trf.xlu0 }
 0x281   : > { %v929_v43 = vsel %vm916_vm0, %v804_v41, -inf }
 0x282   : > { %930 = vmax.xlane.f32.xlu0 %v929_v43 }
 0x288   : > { %v836_v44 = vpop.trf.xlu1 }
 0x289   : > { %v932_v46 = vsel %vm916_vm0, %v836_v44, -inf }
 0x28a   : > { %933 = vmax.xlane.f32.xlu1 %v932_v46 }
 0x290   : > { %v2558_v48 = vpop.trf.xlu0 }
 0x291   : > { %v935_v49 = vsel %vm916_vm0, %v2558_v48, -inf }
 0x292   : > { %936 = vmax.xlane.f32.xlu0 %v935_v49 }
 0x298   : > { %v2562_v50 = vpop.trf.xlu1 }
 0x299   : > { %v938_v52 = vsel %vm916_vm0, %v2562_v50, -inf }
 0x29a   : > { %939 = vmax.xlane.f32.xlu1 %v938_v52 }
 0x2ef   : > { %v919_v53 = vpop.xlane.xlu0 %918 }
 0x2f0   : > { %v941_v55 = vsub.f32 %v676_v32, %v919_v53 }
 0x2f2   : > { %v949_v57 = vmul.f32 1.442695, %v941_v55 }
 0x2f4   : > { %2081 = vpow2.f32 %v949_v57 }
 0x2f7   : > { %v922_v58 = vpop.xlane.xlu1 %921 }
 0x2f8   : > { %v942_v59 = vsub.f32 %v708_v35, %v922_v58 }
 0x2fa   : > { %v951_v61 = vmul.f32 1.442695, %v942_v59 }
 0x2fc   : > { %2083 = vpow2.f32 %v951_v61 }
 0x2fe   : > { %v2082_v62 = vpop.eup %2081 }
 0x2ff   : > { %v925_v0 = vpop.xlane.xlu1 %924  ;;  %1900 = vmatmul.mubr.msk.f32.vlgmr.msra.gmra.mrb[16].mxu0 %vm989_vm2, %v2082_v62  ;;  %v965_v2 = vsel %vm916_vm0, %v2082_v62, 0.0 }
 0x300   : > { %v943_v3 = vsub.f32 %v740_v39, %v925_v0  ;;  %2020 = vmatpush3.bf16.msra.mxu0 %v2019_v36  ;;  %966 = vadd.xlane.f32.xlu0 %v965_v2 }
 0x301   : > { %1906 = vmatprep.mubr.msk.f32.mxu0 %vm2179_vm1, %v2177_v24  ;;  %2021 = vmatprep.subr.bf16.mxu0 %v2178_v10 }
 0x302   : > { %v953_v4 = vmul.f32 1.442695, %v943_v3 }
 0x304   : > { %2085 = vpow2.f32 %v953_v4 }
 0x306   : > { %v2084_v6 = vpop.eup %2083 }
 0x307   : > { %v928_v7 = vpop.xlane.xlu1 %927  ;;  %1907 = vmatmul.mubr.msk.f32.vlgmr.msra.gmra.mrb[18].mxu0 %vm989_vm2, %v2084_v6  ;;  %v968_v9 = vsel %vm916_vm0, %v2084_v6, 0.0 }
 0x308   : > { %v944_v12 = vsub.f32 %v772_v40, %v928_v7  ;;  %2023 = vmatpush3.bf16.msra.mxu0 %v2022_v45  ;;  %969 = vadd.xlane.f32.xlu1 %v968_v9 }
 0x309   : > { %1913 = vmatprep.mubr.msk.f32.mxu0 %vm2179_vm1, %v2177_v24  ;;  %2024 = vmatprep.subr.bf16.mxu0 %v2178_v10 }
 0x30a   : > { %v955_v29 = vmul.f32 1.442695, %v944_v12 }
 0x30c   : > { %2087 = vpow2.f32 %v955_v29 }
 0x30e   : > { %v2086_v33 = vpop.eup %2085 }
 0x30f   : > { %v931_v36 = vpop.xlane.xlu0 %930  ;;  %1914 = vmatmul.mubr.msk.f32.vlgmr.msra.gmra.mrb[20].mxu0 %vm989_vm2, %v2086_v33  ;;  %v971_v13 = vsel %vm916_vm0, %v2086_v33, 0.0 }
 0x310   : > { %v945_v14 = vsub.f32 %v804_v41, %v931_v36  ;;  %2026 = vmatpush3.bf16.msra.mxu0 %v2025_v54  ;;  %972 = vadd.xlane.f32.xlu0 %v971_v13 }
 0x311   : > { %1920 = vmatprep.mubr.msk.f32.mxu0 %vm2179_vm1, %v2177_v24  ;;  %2027 = vmatprep.subr.bf16.mxu0 %v2178_v10 }
 0x312   : > { %v957_v38 = vmul.f32 1.442695, %v945_v14 }
 0x314   : > { %2089 = vpow2.f32 %v957_v38 }
 0x316   : > { %v2088_v42 = vpop.eup %2087 }
 0x317   : > { %v934_v45 = vpop.xlane.xlu1 %933  ;;  %1921 = vmatmul.mubr.msk.f32.vlgmr.msra.gmra.mrb[22].mxu0 %vm989_vm2, %v2088_v42  ;;  %v974_v17 = vsel %vm916_vm0, %v2088_v42, 0.0 }
 0x318   : > { %v946_v19 = vsub.f32 %v836_v44, %v934_v45  ;;  %2029 = vmatpush3.bf16.msra.mxu0 %v2028_v63  ;;  %975 = vadd.xlane.f32.xlu1 %v974_v17 }
 0x319   : > { %1927 = vmatprep.mubr.msk.f32.mxu0 %vm2179_vm1, %v2177_v24  ;;  %2030 = vmatprep.subr.bf16.mxu0 %v2178_v10 }
 0x31a   : > { %v959_v47 = vmul.f32 1.442695, %v946_v19 }
 0x31c   : > { %2091 = vpow2.f32 %v959_v47 }
 0x31e   : > { %v2090_v51 = vpop.eup %2089 }
 0x31f   : > { %v937_v54 = vpop.xlane.xlu0 %936  ;;  %1928 = vmatmul.mubr.msk.f32.vlgmr.msra.gmra.mrb[24].mxu0 %vm989_vm2, %v2090_v51  ;;  %v977_v21 = vsel %vm916_vm0, %v2090_v51, 0.0 }
 0x320   : > { %v947_v23 = vsub.f32 %v2558_v48, %v937_v54  ;;  %2032 = vmatpush3.bf16.msra.mxu0 %v2031_v8  ;;  %978 = vadd.xlane.f32.xlu0 %v977_v21 }
 0x321   : > { %1934 = vmatprep.mubr.msk.f32.mxu0 %vm2179_vm1, %v2177_v24  ;;  %2033 = vmatprep.subr.bf16.mxu0 %v2178_v10 }
 0x322   : > { %v961_v56 = vmul.f32 1.442695, %v947_v23 }
 0x324   : > { %2093 = vpow2.f32 %v961_v56 }
 0x326   : > { %v2092_v60 = vpop.eup %2091 }
 0x327   : > { %v940_v63 = vpop.xlane.xlu1 %939  ;;  %1935 = vmatmul.mubr.msk.f32.vlgmr.msra.gmra.mrb[26].mxu0 %vm989_vm2, %v2092_v60  ;;  %v980_v25 = vsel %vm916_vm0, %v2092_v60, 0.0 }
 0x328   : > { %v948_v26 = vsub.f32 %v2562_v50, %v940_v63  ;;  %2035 = vmatpush3.bf16.msra.mxu0 %v2034_v20  ;;  %981 = vadd.xlane.f32.xlu1 %v980_v25 }
 0x329   : > { %1941 = vmatprep.mubr.msk.f32.mxu0 %vm2179_vm1, %v2177_v24  ;;  %2036 = vmatprep.subr.bf16.mxu0 %v2178_v10 }
 0x32a   : > { %v963_v1 = vmul.f32 1.442695, %v948_v26 }
 0x32c   : > { %2095 = vpow2.f32 %v963_v1 }
 0x32e   : > { %v2094_v5 = vpop.eup %2093 }
 0x32f   : > { %1942 = vmatmul.mubr.msk.f32.vlgmr.msra.gmra.mrb[28].mxu0 %vm989_vm2, %v2094_v5  ;;  %v983_v8 = vsel %vm916_vm0, %v2094_v5, 0.0 }
 0x330   : > { %2038 = vmatpush3.bf16.msra.mxu0 %v2037_v31  ;;  %984 = vadd.xlane.f32.xlu0 %v983_v8 }
 0x331   : > { %1948 = vmatprep.mubr.msk.f32.mxu0 %vm2179_vm1, %v2177_v24 }
 0x336   : > { %v2096_v11 = vpop.eup %2095 }
 0x337   : > { %1949 = vmatmul.mubr.msk.f32.vlgmr.msra.gmra.mrb[30].mxu0 %vm989_vm2, %v2096_v11  ;;  %v986_v10 = vsel %vm916_vm0, %v2096_v11, 0.0 }
 0x338   : > { %987 = vadd.xlane.f32.xlu1 %v986_v10 }
 0x38d   : > { %v967_v15 = vpop.xlane.xlu0 %966 }
 0x38e   : > { %2097 = vrcp.f32 %v967_v15 }
 0x395   : > { %v970_v20 = vpop.xlane.xlu1 %969 }
 0x396   : > { %2099 = vrcp.f32 %v970_v20 }
 0x398   : > { %v2098_v28 = vpop.eup %2097 }
 0x39d   : > { %v973_v24 = vpop.xlane.xlu0 %972 }
 0x39e   : > { %2101 = vrcp.f32 %v973_v24 }
 0x3a0   : > { %v2100_v37 = vpop.eup %2099 }
 0x3a5   : > { %v976_v41 = vpop.xlane.xlu1 %975 }
 0x3a6   : > { %2103 = vrcp.f32 %v976_v41 }
 0x3a8   : > { %v2102_v49 = vpop.eup %2101 }
 0x3ad   : > { %v979_v59 = vpop.xlane.xlu0 %978 }
 0x3ae   : > { %2105 = vrcp.f32 %v979_v59 }
 0x3b0   : > { %v2104_v6 = vpop.eup %2103 }
 0x3b5   : > { %v982_v38 = vpop.xlane.xlu1 %981 }
 0x3b6   : > { %2107 = vrcp.f32 %v982_v38 }
 0x3b8   : > { %v2106_v51 = vpop.eup %2105 }
 0x3bd   : > { %v985_v26 = vpop.xlane.xlu0 %984 }
 0x3be   : > { %2109 = vrcp.f32 %v985_v26 }
 0x3c0   : > { %v2108_v15 = vpop.eup %2107 }
 0x3d2   : > { %v1059_v30 = vpop.f32.mrb[16].mxu0 }
 0x3d3   : > { %v1590_v27 = vmul.f32 %v2098_v28, %v1059_v30  ;;  %v1901_v31 = vpop.f32.mrb[17].mxu0 }
 0x3d5   : > { %v1599_v32 = vmul.f32 %v2628_v22, %v1590_v27 }
 0x3d7   : > { %v1608_v34 = vsel %vm1607_vm3, %v1599_v32, 0.0 }
 0x3d8   : > { %v1609_v35 = vrot.slane %v1608_v34, 4 }
 0x3da   : > { %v1610_v39 = vadd.f32 %v1609_v35, %v1608_v34  ;;  %v1132_v18 = vpop.f32.mrb[18].mxu0  ;;  %v988_v34 = vpop.xlane.xlu1 %987 }
 0x3db   : > { %v1591_v40 = vmul.f32 %v2100_v37, %v1132_v18  ;;  %v1908_v16 = vpop.f32.mrb[19].mxu0  ;;  %2111 = vrcp.f32 %v988_v34 }
 0x3dc   : > { %v1611_v44 = vrot.slane %v1610_v39, 2  ;;  %v2110_v16 = vpop.eup %2109 }
 0x3dd   : > { %v1600_v43 = vmul.f32 %v2628_v22, %v1591_v40 }
 0x3de   : > { %v1612_v50 = vadd.f32 %v1611_v44, %v1610_v39 }
 0x3df   : > { %v1615_v46 = vsel %vm1607_vm3, %v1600_v43, 0.0 }
 0x3e0   : > { %v1616_v48 = vrot.slane %v1615_v46, 4  ;;  %v1613_v62 = vrot.slane %v1612_v50, 1 }
 0x3e2   : > { %v1617_v52 = vadd.f32 %v1616_v48, %v1615_v46  ;;  %v1205_v53 = vpop.f32.mrb[20].mxu0  ;;  %v1614_v7 = vadd.f32 %v1613_v62, %v1612_v50 }
 0x3e3   : > { %v1592_v55 = vmul.f32 %v2102_v49, %v1205_v53  ;;  %v1915_v57 = vpop.f32.mrb[21].mxu0 }
 0x3e4   : > { %v1618_v58 = vrot.slane %v1617_v52, 2 }
 0x3e5   : > { %v1601_v61 = vmul.f32 %v2628_v22, %v1592_v55  ;;  %v2112_v59 = vpop.eup %2111 }
 0x3e6   : > { %v1619_v0 = vadd.f32 %v1618_v58, %v1617_v52 }
 0x3e7   : > { %v1622_v2 = vsel %vm1607_vm3, %v1601_v61, 0.0 }
 0x3e8   : > { %v1620_v3 = vrot.slane %v1619_v0, 1  ;;  %v1623_v4 = vrot.slane %v1622_v2, 4 }
 0x3ea   : > { %v1621_v9 = vadd.f32 %v1620_v3, %v1619_v0  ;;  %v1624_v12 = vadd.f32 %v1623_v4, %v1622_v2  ;;  %v1278_v29 = vpop.f32.mrb[22].mxu0 }
 0x3eb   : > { %v1593_v33 = vmul.f32 %v2104_v6, %v1278_v29  ;;  %v1922_v36 = vpop.f32.mrb[23].mxu0 }
 0x3ec   : > { %v1673_v13 = vsel %vm1672_vm4, %v1621_v9, %v1614_v7  ;;  %v1625_v14 = vrot.slane %v1624_v12, 2 }
 0x3ed   : > { %v1602_v42 = vmul.f32 %v2628_v22, %v1593_v33 }
 0x3ee   : > { %v1626_v45 = vadd.f32 %v1625_v14, %v1624_v12 }
 0x3ef   : > { %v1629_v17 = vsel %vm1607_vm3, %v1602_v42, 0.0 }
 0x3f0   : > { %v1627_v19 = vrot.slane %v1626_v45, 1  ;;  %v1630_v47 = vrot.slane %v1629_v17, 4 }
 0x3f2   : > { %v1628_v54 = vadd.f32 %v1627_v19, %v1626_v45  ;;  %v1631_v21 = vadd.f32 %v1630_v47, %v1629_v17  ;;  %v1351_v23 = vpop.f32.mrb[24].mxu0 }
 0x3f3   : > { %v1594_v56 = vmul.f32 %v2106_v51, %v1351_v23  ;;  %v1929_v60 = vpop.f32.mrb[25].mxu0 }
 0x3f4   : > { %v1675_v63 = vsel %vm1674_vm5, %v1628_v54, %v1673_v13  ;;  %v1632_v25 = vrot.slane %v1631_v21, 2 }
 0x3f5   : > { %v1603_v1 = vmul.f32 %v2628_v22, %v1594_v56 }
 0x3f6   : > { %v1633_v5 = vadd.f32 %v1632_v25, %v1631_v21 }
 0x3f7   : > { %v1636_v8 = vsel %vm1607_vm3, %v1603_v1, 0.0 }
 0x3f8   : > { %v1634_v11 = vrot.slane %v1633_v5, 1  ;;  %v1637_v10 = vrot.slane %v1636_v8, 4 }
 0x3fa   : > { %v1635_v20 = vadd.f32 %v1634_v11, %v1633_v5  ;;  %v1638_v28 = vadd.f32 %v1637_v10, %v1636_v8  ;;  %v1424_v30 = vpop.f32.mrb[26].mxu0 }
 0x3fb   : > { %v1595_v27 = vmul.f32 %v2108_v15, %v1424_v30  ;;  %v1936_v31 = vpop.f32.mrb[27].mxu0 }
 0x3fc   : > { %v1639_v24 = vrot.slane %v1638_v28, 2  ;;  %v1677_v32 = vsel %vm1676_vm6, %v1635_v20, %v1675_v63 }
 0x3fd   : > { %v1604_v35 = vmul.f32 %v2628_v22, %v1595_v27 }
 0x3fe   : > { %v1640_v37 = vadd.f32 %v1639_v24, %v1638_v28 }
 0x3ff   : > { %v1643_v39 = vsel %vm1607_vm3, %v1604_v35, 0.0 }
 0x400   : > { %v1641_v18 = vrot.slane %v1640_v37, 1  ;;  %v1644_v40 = vrot.slane %v1643_v39, 4 }
 0x402   : > { %v1642_v41 = vadd.f32 %v1641_v18, %v1640_v37  ;;  %v1645_v43 = vadd.f32 %v1644_v40, %v1643_v39  ;;  %v1497_v44 = vpop.f32.mrb[28].mxu0 }
 0x403   : > { %v1596_v46 = vmul.f32 %v2110_v16, %v1497_v44  ;;  %v1943_v48 = vpop.f32.mrb[29].mxu0 }
 0x404   : > { %v1646_v49 = vrot.slane %v1645_v43, 2  ;;  %v1679_v50 = vsel %vm1678_vm7, %v1642_v41, %v1677_v32 }
 0x405   : > { %v1605_v52 = vmul.f32 %v2628_v22, %v1596_v46 }
 0x406   : > { %v1647_v53 = vadd.f32 %v1646_v49, %v1645_v43 }
 0x407   : > { %v1650_v55 = vsel %vm1607_vm3, %v1605_v52, 0.0 }
 0x408   : > { %v1648_v57 = vrot.slane %v1647_v53, 1  ;;  %v1651_v58 = vrot.slane %v1650_v55, 4 }
 0x40a   : > { %v1649_v61 = vadd.f32 %v1648_v57, %v1647_v53  ;;  %v1652_v62 = vadd.f32 %v1651_v58, %v1650_v55  ;;  %v1570_v0 = vpop.f32.mrb[30].mxu0 }
 0x40b   : > { %v1597_v2 = vmul.f32 %v2112_v59, %v1570_v0  ;;  %v1950_v3 = vpop.f32.mrb[31].mxu0 }
 0x40c   : > { %v1653_v4 = vrot.slane %v1652_v62, 2  ;;  %v1681_v6 = vsel %vm1680_vm8, %v1649_v61, %v1679_v50 }
 0x40d   : > { %v1606_v7 = vmul.f32 %v2628_v22, %v1597_v2 }
 0x40e   : > { %v1654_v9 = vadd.f32 %v1653_v4, %v1652_v62 }
 0x40f   : > { %v1657_v12 = vsel %vm1607_vm3, %v1606_v7, 0.0 }
 0x410   : > { %v1655_v29 = vrot.slane %v1654_v9, 1  ;;  %v1658_v33 = vrot.slane %v1657_v12, 4 }
 0x412   : > { %v1656_v36 = vadd.f32 %v1655_v29, %v1654_v9  ;;  %v1659_v13 = vadd.f32 %v1658_v33, %v1657_v12 }
 0x414   : > { %v1660_v14 = vrot.slane %v1659_v13, 2  ;;  %v1683_v38 = vsel %vm1682_vm9, %v1656_v36, %v1681_v6 }
 0x416   : > { %v1661_v42 = vadd.f32 %v1660_v14, %v1659_v13 }
 0x418   : > { %v1662_v45 = vrot.slane %v1661_v42, 1 }
 0x41a   : > { %v1663_v22 = vadd.f32 %v1662_v45, %v1661_v42 }
 0x41c   : > { %v1685_v17 = vsel %vm1684_vm10, %v1663_v22, %v1683_v38 }
 0x41d   : > { %1687 = vst [vmem:[%s247_s15] sm:$0xff] %v1685_v17 }
 0x41e   : > { %2126 = shalt.err (!%p2123_p3)
}
 0x41f   : > { %s2127_s12 = scalar_lea.hbm %s2651_s29, 128  ;;  %s2131_s16 = scalar_lea.hbm %s2699_s6, 256 }
 0x420   : > { %p2128_p4 = scmp.ne.s32.totalorder %s2651_s29, %s2127_s12  ;;  %p2132_p9 = scmp.lt.u32.totalorder %s2651_s29, %s2699_s6 }
 0x421   : > { %p2133_p10 = scmp.lt.u32.totalorder %s2131_s16, %s2127_s12  ;;  %p2135_p12 = scmp.lt.u32.totalorder %s2127_s12, %s2651_s29 }
 0x422   : > { %p2129_p7 = pnand %p2128_p4, %p2254_p5 }
 0x423   : > { %p2134_p11 = por %p2133_p10, %p2132_p9 }
 0x424   : > { %p2130_p8 = pneg %p2129_p7 }
 0x425   : > { %p2136_p13 = por %p2135_p12, %p2134_p11 }
 0x427   : > { %p2137_p0 = pnand %p2136_p13, %p2130_p8 }
 0x429   : > { %2140 = shalt.err (!%p2137_p0)
}
 0x42a   : > { %2039 = dma.vmem_to_hbm [thread:$0]  (%p2254_p5), %s2653_s20, 128, %s2651_s29, %s1689_s9  }
 0x42b PF: > { %p2045_p1 = scmp.ge.s32.totalorder %s2175_s24, 2  ;;  %s1714_s15 = sand.u32 1, %s2163_s21  }
 0x42c   : > { %s1715_s26 = scalar_lea.sflag [#allocation3], %s1714_s15 }
 0x42d   : > { %p2042_p2 = pnand %p2045_p1, %p2258_p6 }
 0x42f   : > { %2158 = dma.done.wait (!%p2042_p2), %s1715_s26, 128  }
 0x430   : > { %2160 = vsyncadd (!%p2042_p2), %s1715_s26, 4294967168  ;;  %p16_p3 = scmp.ge.s32.totalorder %s2241_s27, 4   ;;  %s2702_s21 = smov %s2167_s22 }
 0x431   : > { %s2703_s22 = smov %s2171_s23  ;;  %s2704_s23 = smov %s2252_s30 }
 0x432   : > { %s2705_s24 = smov %s2241_s27  ;;  %18 = sbr.rel (!%p16_p3) target bundleno = 3 (0x3), region = 79 }
 0x439   :  { %1720 = vsyncpa [#allocation3], 1 }
 0x43a   :  { %1722 = vsyncpa [#allocation3 + $0x1], 1 }

</bundles_post_ra>
